<compile_context>
chip_gen: v5e
topology: v5e:2x2
jax: 0.10.0
libtpu: 0.0.40
codegen_flags: <defaults>
</compile_context>

<pallas_src>
import functools
import math

import jax
import jax.numpy as jnp
from jax.experimental import pallas as pl
from jax.experimental.pallas import tpu as pltpu

EPS = 1e-5


def _conv_bn_kernel(x_ref, w_ref, b_ref, g_ref, be_ref, o_ref,
                    *, KH, stride, pad, Cin):
    """Fused reflect/zero pad + conv (banded MXU matmuls) + BatchNorm."""
    N, H, WCin = x_ref.shape
    W = WCin // Cin
    NHo, WoCout = o_ref.shape
    Cout = g_ref.shape[-1]
    Wo = WoCout // Cout
    Ho = NHo // N
    M = NHo * Wo                      # number of (n, h, w) positions per channel
    f32 = jnp.float32

    x = x_ref[...].astype(f32)        # (N, H, W*Cin), channels packed into lanes

    # ---- ReflectionPad2d(1), then Conv2d zero padding `pad`, built in VMEM --
    # W (lane) direction: reflected column w=1 / w=W-2, then optional zero pad.
    parts = [x[:, :, Cin:2 * Cin], x, x[:, :, (W - 2) * Cin:(W - 1) * Cin]]
    if pad:
        zw = jnp.zeros((N, H, pad * Cin), f32)
        parts = [zw, *parts, zw]
    xw = jnp.concatenate(parts, axis=2)            # (N, H, Wp*Cin)
    # H (sublane) direction: reflected rows h=1 / h=H-2, then optional zeros.
    parts = [xw[:, 1:2], xw, xw[:, H - 2:H - 1]]
    if pad:
        zh = jnp.zeros((N, pad, xw.shape[2]), f32)
        parts = [zh, *parts, zh]
    xp = jnp.concatenate(parts, axis=1)            # (N, Hp, Wp*Cin)
    WpCin = xp.shape[2]

    # ---- Convolution: KH matmuls (N*Ho, Wp*Cin) @ (Wp*Cin, Wo*Cout) ---------
    acc = jnp.zeros((NHo, WoCout), f32)
    for kh in range(KH):               # static unroll (KH is small, e.g. 3)
        if stride == 1:
            xk = xp[:, kh:kh + Ho, :]
        else:
            xk = jax.lax.slice(xp, (0, kh, 0),
                               (N, kh + (Ho - 1) * stride + 1, WpCin),
                               (1, stride, 1))
        xk = xk.reshape(NHo, WpCin)                # trivial leading-dim merge
        acc = acc + jnp.dot(xk, w_ref[kh], preferred_element_type=f32)

    # Conv bias, broadcast to the packed lane layout (lane = wo*Cout + c).
    # (Mathematically BN removes the bias again, but keep it for fidelity.)
    acc = acc + jnp.tile(b_ref[...], (1, Wo))                    # (1, Wo*Cout)

    # ---- BatchNorm2d (training mode): per-channel mean/var over (N, H, W) ---
    # Row reduction (over N*Ho) via ones-row matmul; lane reduction (over Wo
    # groups of Cout lanes) via a 0/1 channel-fold matrix — both on the MXU.
    ones_r = jnp.ones((1, NHo), f32)
    lane = jax.lax.broadcasted_iota(jnp.int32, (WoCout, Cout), 0)
    chan = jax.lax.broadcasted_iota(jnp.int32, (WoCout, Cout), 1)
    fold = (lane % Cout == chan).astype(f32)                     # (Wo*Cout, Cout)

    row_sum = jnp.dot(ones_r, acc, preferred_element_type=f32)   # (1, Wo*Cout)
    mean = jnp.dot(row_sum, fold, preferred_element_type=f32) * (1.0 / M)
    cen = acc - jnp.tile(mean, (1, Wo))                          # lane-dense

    row_ssq = jnp.dot(ones_r, cen * cen, preferred_element_type=f32)
    var = jnp.dot(row_ssq, fold, preferred_element_type=f32) * (1.0 / M)

    scale = g_ref[...] * jax.lax.rsqrt(var + EPS)                # (1, Cout)
    scale_p = jnp.tile(scale, (1, Wo))
    beta_p = jnp.tile(be_ref[...], (1, Wo))

    # Lane-dense (N*Ho, Wo*Cout) store -> full unmasked vst.
    o_ref[...] = (cen * scale_p + beta_p).astype(o_ref.dtype)


def _band_weight(weight, Wp, Wo, stride):
    """(Cout, Cin, KH, KW) -> (KH, Wp*Cin, Wo*Cout) banded matrix folding kw into K."""
    Cout, Cin, KH, KW = weight.shape
    w_t = jnp.transpose(weight, (2, 3, 1, 0))                      # (KH, KW, Cin, Cout)
    kw_rel = jnp.arange(Wp)[:, None] - stride * jnp.arange(Wo)[None, :]   # (Wp, Wo)
    valid = (kw_rel >= 0) & (kw_rel < KW)
    kw_idx = jnp.clip(kw_rel, 0, KW - 1)
    wb = w_t[:, kw_idx, :, :]                                      # (KH, Wp, Wo, Cin, Cout)
    wb = jnp.where(valid[None, :, :, None, None], wb, 0.0)
    wb = jnp.transpose(wb, (0, 1, 3, 2, 4)).reshape(KH, Wp * Cin, Wo * Cout)
    return wb.astype(jnp.float32)


@functools.partial(jax.jit, static_argnames=("stride", "pad"))
def reflect_conv_bn_forward(x_nchw, weight, bias, gamma, beta, *, stride=1, pad=0):
    """Forward pass matching reflect_conv_bn.forward (PyTorch NCHW in/out)."""
    N, Cin, H, W = x_nchw.shape
    Cout, _, KH, KW = weight.shape
    Hp = H + 2 + 2 * pad
    Wp = W + 2 + 2 * pad
    Ho = (Hp - KH) // stride + 1
    Wo = (Wp - KW) // stride + 1

    # NCHW -> (N, H, W*Cin): pure layout plumbing, fused by XLA under jit.
    x3 = jnp.transpose(x_nchw, (0, 2, 3, 1)).reshape(N, H, W * Cin).astype(jnp.float32)
    wb = _band_weight(weight, Wp, Wo, stride)      # tiny; precomputable per weight
    b2 = bias.reshape(1, Cout).astype(jnp.float32)
    g2 = gamma.reshape(1, Cout).astype(jnp.float32)
    be2 = beta.reshape(1, Cout).astype(jnp.float32)

    kern = functools.partial(_conv_bn_kernel, KH=KH, stride=stride, pad=pad, Cin=Cin)

    out2d = pl.pallas_call(
        kern,
        out_shape=jax.ShapeDtypeStruct((N * Ho, Wo * Cout), jnp.float32),
        grid=(1,),
        in_specs=[
            pl.BlockSpec((N, H, W * Cin), lambda i: (0, 0, 0)),
            pl.BlockSpec((KH, Wp * Cin, Wo * Cout), lambda i: (0, 0, 0)),
            pl.BlockSpec((1, Cout), lambda i: (0, 0)),
            pl.BlockSpec((1, Cout), lambda i: (0, 0)),
            pl.BlockSpec((1, Cout), lambda i: (0, 0)),
        ],
        out_specs=pl.BlockSpec((N * Ho, Wo * Cout), lambda i: (0, 0)),
        compiler_params=pltpu.CompilerParams(
            dimension_semantics=("arbitrary",)),
    )(x3, wb, b2, g2, be2)

    # (N*Ho, Wo*Cout) -> NCHW (PyTorch convention).
    out = out2d.reshape(N, Ho, Wo, Cout)
    return jnp.transpose(out, (0, 3, 1, 2))


if __name__ == "__main__":
    key = jax.random.PRNGKey(0)
    k_x, k_w, k_b = jax.random.split(key, 3)

    # Shapes implied by the module: NCHW input, 3x3 kernel, stride 1, pad 0.
    N, Cin, H, W = 2, 4, 16, 16
    Cout, KH, KW = 8, 3, 3
    stride, pad = 1, 0

    x = jax.random.normal(k_x, (N, Cin, H, W), jnp.float32)

    # Deterministic parameter init (PyTorch-style uniform bounds for conv,
    # BatchNorm default gamma=1 / beta=0).
    fan_in = Cin * KH * KW
    bound = 1.0 / math.sqrt(fan_in)
    weight = jax.random.uniform(k_w, (Cout, Cin, KH, KW), jnp.float32, -bound, bound)
    bias = jax.random.uniform(k_b, (Cout,), jnp.float32, -bound, bound)
    gamma = jnp.ones((Cout,), jnp.float32)
    beta = jnp.zeros((Cout,), jnp.float32)

    out = reflect_conv_bn_forward(x, weight, bias, gamma, beta,
                                  stride=stride, pad=pad)
    out = jax.block_until_ready(out)

    # Pure-JAX reference (reflect pad -> conv -> training-mode batchnorm).
    xr = jnp.pad(x, ((0, 0), (0, 0), (1, 1), (1, 1)), mode="reflect")
    conv = jax.lax.conv_general_dilated(
        xr, weight, (stride, stride), [(pad, pad), (pad, pad)],
        dimension_numbers=("NCHW", "OIHW", "NCHW"))
    conv = conv + bias[None, :, None, None]
    mean = conv.mean(axis=(0, 2, 3), keepdims=True)
    var = ((conv - mean) ** 2).mean(axis=(0, 2, 3), keepdims=True)
    ref = ((conv - mean) * jax.lax.rsqrt(var + EPS)
           * gamma[None, :, None, None] + beta[None, :, None, None])

    assert out.shape == (N, Cout, H, W)
    err = float(jnp.max(jnp.abs(out - ref)))
    assert err < 1e-3, f"mismatch vs reference: {err}"
    print("KERNEL_OK")
</pallas_src>

<mosaic_0001>
module attributes {stable_mosaic.version = 11 : i64} {
  func.func @_conv_bn_kernel(%arg0: i32, %arg1: memref<2x16x64xf32, #tpu.memory_space<vmem>>, %arg2: memref<3x72x128xf32, #tpu.memory_space<vmem>>, %arg3: memref<1x8xf32, #tpu.memory_space<vmem>>, %arg4: memref<1x8xf32, #tpu.memory_space<vmem>>, %arg5: memref<1x8xf32, #tpu.memory_space<vmem>>, %arg6: memref<32x128xf32, #tpu.memory_space<vmem>>) attributes {dimension_semantics = [#tpu.dimension_semantics<arbitrary>], iteration_bounds = array<i64: 1>, scalar_prefetch = 0 : i64, scratch_operands = 0 : i64, tpu.core_type = #tpu.core_type<tc>, window_params = [{pipeline_mode = #tpu.pipeline_mode<synchronous>, transform_indices = @transform_0, window_bounds = array<i64: 2, 16, 64>}, {pipeline_mode = #tpu.pipeline_mode<synchronous>, transform_indices = @transform_1, window_bounds = array<i64: 3, 72, 128>}, {pipeline_mode = #tpu.pipeline_mode<synchronous>, transform_indices = @transform_2, window_bounds = array<i64: 1, 8>}, {pipeline_mode = #tpu.pipeline_mode<synchronous>, transform_indices = @transform_3, window_bounds = array<i64: 1, 8>}, {pipeline_mode = #tpu.pipeline_mode<synchronous>, transform_indices = @transform_4, window_bounds = array<i64: 1, 8>}, {pipeline_mode = #tpu.pipeline_mode<synchronous>, transform_indices = @transform_5, window_bounds = array<i64: 32, 128>}]} {
    %c0 = arith.constant 0 : index
    %c0_0 = arith.constant 0 : index
    %c0_1 = arith.constant 0 : index
    %0 = vector.load %arg1[%c0, %c0_0, %c0_1] : memref<2x16x64xf32, #tpu.memory_space<vmem>>, vector<2x16x64xf32>
    %1 = vector.extract_strided_slice %0 {offsets = [0, 0, 4], sizes = [2, 16, 4], strides = [1, 1, 1]} : vector<2x16x64xf32> to vector<2x16x4xf32>
    %2 = vector.extract_strided_slice %0 {offsets = [0, 0, 56], sizes = [2, 16, 4], strides = [1, 1, 1]} : vector<2x16x64xf32> to vector<2x16x4xf32>
    %3 = tpu.concatenate %1, %0, %2 in 2 : vector<2x16x4xf32>, vector<2x16x64xf32>, vector<2x16x4xf32> -> vector<2x16x72xf32>
    %4 = vector.extract_strided_slice %3 {offsets = [0, 1, 0], sizes = [2, 1, 72], strides = [1, 1, 1]} : vector<2x16x72xf32> to vector<2x1x72xf32>
    %5 = vector.extract_strided_slice %3 {offsets = [0, 14, 0], sizes = [2, 1, 72], strides = [1, 1, 1]} : vector<2x16x72xf32> to vector<2x1x72xf32>
    %6 = tpu.concatenate %4, %3, %5 in 1 : vector<2x1x72xf32>, vector<2x16x72xf32>, vector<2x1x72xf32> -> vector<2x18x72xf32>
    %cst = arith.constant 0.000000e+00 : f32
    %7 = vector.broadcast %cst : f32 to vector<32x128xf32>
    %8 = vector.extract_strided_slice %6 {offsets = [0, 0, 0], sizes = [2, 16, 72], strides = [1, 1, 1]} : vector<2x18x72xf32> to vector<2x16x72xf32>
    %9 = vector.shape_cast %8 : vector<2x16x72xf32> to vector<32x72xf32>
    %c0_2 = arith.constant 0 : index
    %c0_3 = arith.constant 0 : index
    %c0_4 = arith.constant 0 : index
    %10 = vector.load %arg2[%c0_2, %c0_3, %c0_4] : memref<3x72x128xf32, #tpu.memory_space<vmem>>, vector<1x72x128xf32>
    %11 = vector.shape_cast %10 : vector<1x72x128xf32> to vector<72x128xf32>
    %cst_5 = arith.constant dense<0.000000e+00> : vector<32x128xf32>
    %12 = tpu.matmul %9, %11, %cst_5 {dimension_numbers = #tpu.dot_dimension_numbers<[1], [0], [0], [1], [0, 0, 1, 1], [], []>} : vector<32x72xf32>, vector<72x128xf32>, vector<32x128xf32> -> vector<32x128xf32>
    %13 = arith.addf %7, %12 : vector<32x128xf32>
    %14 = vector.extract_strided_slice %6 {offsets = [0, 1, 0], sizes = [2, 16, 72], strides = [1, 1, 1]} : vector<2x18x72xf32> to vector<2x16x72xf32>
    %15 = vector.shape_cast %14 : vector<2x16x72xf32> to vector<32x72xf32>
    %c1 = arith.constant 1 : index
    %c0_6 = arith.constant 0 : index
    %c0_7 = arith.constant 0 : index
    %16 = vector.load %arg2[%c1, %c0_6, %c0_7] : memref<3x72x128xf32, #tpu.memory_space<vmem>>, vector<1x72x128xf32>
    %17 = vector.shape_cast %16 : vector<1x72x128xf32> to vector<72x128xf32>
    %cst_8 = arith.constant dense<0.000000e+00> : vector<32x128xf32>
    %18 = tpu.matmul %15, %17, %cst_8 {dimension_numbers = #tpu.dot_dimension_numbers<[1], [0], [0], [1], [0, 0, 1, 1], [], []>} : vector<32x72xf32>, vector<72x128xf32>, vector<32x128xf32> -> vector<32x128xf32>
    %19 = arith.addf %13, %18 : vector<32x128xf32>
    %20 = vector.extract_strided_slice %6 {offsets = [0, 2, 0], sizes = [2, 16, 72], strides = [1, 1, 1]} : vector<2x18x72xf32> to vector<2x16x72xf32>
    %21 = vector.shape_cast %20 : vector<2x16x72xf32> to vector<32x72xf32>
    %c2 = arith.constant 2 : index
    %c0_9 = arith.constant 0 : index
    %c0_10 = arith.constant 0 : index
    %22 = vector.load %arg2[%c2, %c0_9, %c0_10] : memref<3x72x128xf32, #tpu.memory_space<vmem>>, vector<1x72x128xf32>
    %23 = vector.shape_cast %22 : vector<1x72x128xf32> to vector<72x128xf32>
    %cst_11 = arith.constant dense<0.000000e+00> : vector<32x128xf32>
    %24 = tpu.matmul %21, %23, %cst_11 {dimension_numbers = #tpu.dot_dimension_numbers<[1], [0], [0], [1], [0, 0, 1, 1], [], []>} : vector<32x72xf32>, vector<72x128xf32>, vector<32x128xf32> -> vector<32x128xf32>
    %25 = arith.addf %19, %24 : vector<32x128xf32>
    %c0_12 = arith.constant 0 : index
    %c0_13 = arith.constant 0 : index
    %26 = vector.load %arg3[%c0_12, %c0_13] : memref<1x8xf32, #tpu.memory_space<vmem>>, vector<1x8xf32>
    %27 = tpu.concatenate %26, %26, %26, %26, %26, %26, %26, %26, %26, %26, %26, %26, %26, %26, %26, %26 in 1 : vector<1x8xf32>, vector<1x8xf32>, vector<1x8xf32>, vector<1x8xf32>, vector<1x8xf32>, vector<1x8xf32>, vector<1x8xf32>, vector<1x8xf32>, vector<1x8xf32>, vector<1x8xf32>, vector<1x8xf32>, vector<1x8xf32>, vector<1x8xf32>, vector<1x8xf32>, vector<1x8xf32>, vector<1x8xf32> -> vector<1x128xf32>
    %28 = vector.broadcast %27 : vector<1x128xf32> to vector<32x128xf32>
    %29 = arith.addf %25, %28 : vector<32x128xf32>
    %cst_14 = arith.constant 1.000000e+00 : f32
    %30 = vector.broadcast %cst_14 : f32 to vector<1x32xf32>
    %31 = tpu.iota {dimensions = array<i32: 0>} : vector<128x8xi32>
    %32 = tpu.iota {dimensions = array<i32: 1>} : vector<128x8xi32>
    %c8_i32 = arith.constant 8 : i32
    %c0_i32 = arith.constant 0 : i32
    %33 = arith.cmpi eq, %c8_i32, %c0_i32 : i32
    %c1_i32 = arith.constant 1 : i32
    %34 = arith.select %33, %c1_i32, %c8_i32 : i32
    %35 = vector.broadcast %34 : i32 to vector<128x8xi32>
    %36 = arith.remsi %31, %35 : vector<128x8xi32>
    %c0_i32_15 = arith.constant 0 : i32
    %37 = vector.broadcast %c0_i32_15 : i32 to vector<128x8xi32>
    %38 = arith.cmpi ne, %36, %37 : vector<128x8xi32>
    %c0_i32_16 = arith.constant 0 : i32
    %39 = vector.broadcast %c0_i32_16 : i32 to vector<128x8xi32>
    %40 = arith.cmpi slt, %36, %39 : vector<128x8xi32>
    %c0_i32_17 = arith.constant 0 : i32
    %41 = arith.cmpi slt, %34, %c0_i32_17 : i32
    %42 = vector.broadcast %41 : i1 to vector<128x8xi1>
    %43 = vector.broadcast %42 : vector<128x8xi1> to vector<128x8xi1>
    %44 = arith.xori %40, %43 : vector<128x8xi1>
    %45 = arith.andi %44, %38 : vector<128x8xi1>
    %46 = vector.broadcast %34 : i32 to vector<128x8xi32>
    %47 = arith.addi %36, %46 : vector<128x8xi32>
    %48 = arith.select %45, %47, %36 : vector<128x8xi1>, vector<128x8xi32>
    %49 = arith.cmpi eq, %48, %32 : vector<128x8xi32>
    %50 = arith.extui %49 : vector<128x8xi1> to vector<128x8xi32>
    %51 = arith.sitofp %50 : vector<128x8xi32> to vector<128x8xf32>
    %cst_18 = arith.constant dense<0.000000e+00> : vector<1x128xf32>
    %52 = tpu.matmul %30, %29, %cst_18 {dimension_numbers = #tpu.dot_dimension_numbers<[1], [0], [0], [1], [0, 0, 1, 1], [], []>} : vector<1x32xf32>, vector<32x128xf32>, vector<1x128xf32> -> vector<1x128xf32>
    %cst_19 = arith.constant dense<0.000000e+00> : vector<1x8xf32>
    %53 = tpu.matmul %52, %51, %cst_19 {dimension_numbers = #tpu.dot_dimension_numbers<[1], [0], [0], [1], [0, 0, 1, 1], [], []>} : vector<1x128xf32>, vector<128x8xf32>, vector<1x8xf32> -> vector<1x8xf32>
    %cst_20 = arith.constant 0.001953125 : f32
    %54 = vector.broadcast %cst_20 : f32 to vector<1x8xf32>
    %55 = arith.mulf %53, %54 : vector<1x8xf32>
    %56 = tpu.concatenate %55, %55, %55, %55, %55, %55, %55, %55, %55, %55, %55, %55, %55, %55, %55, %55 in 1 : vector<1x8xf32>, vector<1x8xf32>, vector<1x8xf32>, vector<1x8xf32>, vector<1x8xf32>, vector<1x8xf32>, vector<1x8xf32>, vector<1x8xf32>, vector<1x8xf32>, vector<1x8xf32>, vector<1x8xf32>, vector<1x8xf32>, vector<1x8xf32>, vector<1x8xf32>, vector<1x8xf32>, vector<1x8xf32> -> vector<1x128xf32>
    %57 = vector.broadcast %56 : vector<1x128xf32> to vector<32x128xf32>
    %58 = arith.subf %29, %57 : vector<32x128xf32>
    %59 = arith.mulf %58, %58 : vector<32x128xf32>
    %cst_21 = arith.constant dense<0.000000e+00> : vector<1x128xf32>
    %60 = tpu.matmul %30, %59, %cst_21 {dimension_numbers = #tpu.dot_dimension_numbers<[1], [0], [0], [1], [0, 0, 1, 1], [], []>} : vector<1x32xf32>, vector<32x128xf32>, vector<1x128xf32> -> vector<1x128xf32>
    %cst_22 = arith.constant dense<0.000000e+00> : vector<1x8xf32>
    %61 = tpu.matmul %60, %51, %cst_22 {dimension_numbers = #tpu.dot_dimension_numbers<[1], [0], [0], [1], [0, 0, 1, 1], [], []>} : vector<1x128xf32>, vector<128x8xf32>, vector<1x8xf32> -> vector<1x8xf32>
    %cst_23 = arith.constant 0.001953125 : f32
    %62 = vector.broadcast %cst_23 : f32 to vector<1x8xf32>
    %63 = arith.mulf %61, %62 : vector<1x8xf32>
    %c0_24 = arith.constant 0 : index
    %c0_25 = arith.constant 0 : index
    %64 = vector.load %arg4[%c0_24, %c0_25] : memref<1x8xf32, #tpu.memory_space<vmem>>, vector<1x8xf32>
    %cst_26 = arith.constant 9.99999974E-6 : f32
    %65 = vector.broadcast %cst_26 : f32 to vector<1x8xf32>
    %66 = arith.addf %63, %65 : vector<1x8xf32>
    %67 = math.rsqrt %66 : vector<1x8xf32>
    %68 = arith.mulf %64, %67 : vector<1x8xf32>
    %69 = tpu.concatenate %68, %68, %68, %68, %68, %68, %68, %68, %68, %68, %68, %68, %68, %68, %68, %68 in 1 : vector<1x8xf32>, vector<1x8xf32>, vector<1x8xf32>, vector<1x8xf32>, vector<1x8xf32>, vector<1x8xf32>, vector<1x8xf32>, vector<1x8xf32>, vector<1x8xf32>, vector<1x8xf32>, vector<1x8xf32>, vector<1x8xf32>, vector<1x8xf32>, vector<1x8xf32>, vector<1x8xf32>, vector<1x8xf32> -> vector<1x128xf32>
    %c0_27 = arith.constant 0 : index
    %c0_28 = arith.constant 0 : index
    %70 = vector.load %arg5[%c0_27, %c0_28] : memref<1x8xf32, #tpu.memory_space<vmem>>, vector<1x8xf32>
    %71 = tpu.concatenate %70, %70, %70, %70, %70, %70, %70, %70, %70, %70, %70, %70, %70, %70, %70, %70 in 1 : vector<1x8xf32>, vector<1x8xf32>, vector<1x8xf32>, vector<1x8xf32>, vector<1x8xf32>, vector<1x8xf32>, vector<1x8xf32>, vector<1x8xf32>, vector<1x8xf32>, vector<1x8xf32>, vector<1x8xf32>, vector<1x8xf32>, vector<1x8xf32>, vector<1x8xf32>, vector<1x8xf32>, vector<1x8xf32> -> vector<1x128xf32>
    %72 = vector.broadcast %69 : vector<1x128xf32> to vector<32x128xf32>
    %73 = arith.mulf %58, %72 : vector<32x128xf32>
    %74 = vector.broadcast %71 : vector<1x128xf32> to vector<32x128xf32>
    %75 = arith.addf %73, %74 : vector<32x128xf32>
    %c0_29 = arith.constant 0 : index
    %c0_30 = arith.constant 0 : index
    %76 = vector.load %arg6[%c0_29, %c0_30] : memref<32x128xf32, #tpu.memory_space<vmem>>, vector<32x128xf32>
    tpu.vector_store %arg6[%c0_29, %c0_30], %75 {strides = array<i32>} : memref<32x128xf32, #tpu.memory_space<vmem>>, vector<32x128xf32>,
    return
  }
  func.func @transform_0(%arg0: i32) -> (i32, i32, i32) {
    %c0_i32 = arith.constant 0 : i32
    %c0_i32_0 = arith.constant 0 : i32
    %c0_i32_1 = arith.constant 0 : i32
    %c0_i32_2 = arith.constant 0 : i32
    return %c0_i32, %c0_i32_0, %c0_i32_1 : i32, i32, i32
  }
  func.func @transform_1(%arg0: i32) -> (i32, i32, i32) {
    %c0_i32 = arith.constant 0 : i32
    %c0_i32_0 = arith.constant 0 : i32
    %c0_i32_1 = arith.constant 0 : i32
    %c0_i32_2 = arith.constant 0 : i32
    return %c0_i32, %c0_i32_0, %c0_i32_1 : i32, i32, i32
  }
  func.func @transform_2(%arg0: i32) -> (i32, i32) {
    %c0_i32 = arith.constant 0 : i32
    %c0_i32_0 = arith.constant 0 : i32
    %c0_i32_1 = arith.constant 0 : i32
    return %c0_i32, %c0_i32_0 : i32, i32
  }
  func.func @transform_3(%arg0: i32) -> (i32, i32) {
    %c0_i32 = arith.constant 0 : i32
    %c0_i32_0 = arith.constant 0 : i32
    %c0_i32_1 = arith.constant 0 : i32
    return %c0_i32, %c0_i32_0 : i32, i32
  }
  func.func @transform_4(%arg0: i32) -> (i32, i32) {
    %c0_i32 = arith.constant 0 : i32
    %c0_i32_0 = arith.constant 0 : i32
    %c0_i32_1 = arith.constant 0 : i32
    return %c0_i32, %c0_i32_0 : i32, i32
  }
  func.func @transform_5(%arg0: i32) -> (i32, i32) {
    %c0_i32 = arith.constant 0 : i32
    %c0_i32_0 = arith.constant 0 : i32
    %c0_i32_1 = arith.constant 0 : i32
    return %c0_i32, %c0_i32_0 : i32, i32
  }
}

</mosaic_0001>

<bundles_post_ra>
// kernel: reflect_conv_bn_forward.1
= control target key start
LH: loop header
LB: loop body
LE: loop exit
PB: predicated region body
PF: predicated region fallthrough
CT: control target
= control target key end

     0   :  { %s1027_s20 = smov 4   ;;  %s1028_s21 = smov 124   ;;  %vm64_vm0 = vcmask 31744   ;;  %vm69_vm1 = vcmask 556032   ;;  %vm82_vm2 = vcmask 1040384   ;;  %vm1603_vm3 = vcmask 588800   ;;  %s1592_s0 = inlined_call_operand.vmem [shape: f32[2,16,64], index: 0, kind: input, shape index: {}]   ;;  %s1593_s1 = inlined_call_operand.vmem [shape: f32[3,72,128], index: 1, kind: input, shape index: {}]   ;;  %s1594_s2 = inlined_call_operand.vmem [shape: f32[1,8], index: 2, kind: input, shape index: {}]   ;;  %s1595_s4 = inlined_call_operand.vmem [shape: f32[1,8], index: 4, kind: input, shape index: {}]   ;;  %s1596_s3 = inlined_call_operand.vmem [shape: f32[1,8], index: 3, kind: input, shape index: {}]   ;;  %s1597_s5 = inlined_call_operand.vmem [shape: f32[32,128], index: 5, kind: output, shape index: {}]  }
   0x1   :  { %v20_v0 = vld [vmem:[%s1592_s0] sm:$0xff]  ;;  %s1029_s24 = smov 12   ;;  %v108_v2 = vld [vmem:[%s1593_s1 + $0x38] sm:$0xff]  ;;  %v107_v3 = vld [vmem:[%s1593_s1 + $0x30] sm:$0xff]  ;;  %s1030_s25 = smov 8   ;;  %vm114_vm4 = vcmask 1046528  }
   0x2   :  { %40 = vrot.lane.b32.xlu1 %v20_v0, %s1027_s20  ;;  %28 = vrot.lane.b32.xlu0 %v20_v0, %s1028_s21  ;;  %v109_v1 = vld [vmem:[%s1593_s1 + $0x40] sm:$0xff]  ;;  %v932_v4 = vld [vmem:[%s1593_s1 + $0x88] sm:$0xff]  ;;  %s1031_s26 = smov 16   ;;  %s1032_s27 = smov 24   ;;  %vm210_vm5 = vcmask 1045504   ;;  %vm320_vm6 = vcmask 64512  }
   0x3   :  { %52 = vrot.lane.b32.xlu2 %v20_v0, %s1029_s24  ;;  %188 = vmatpush.msra.mxu1 %v109_v1  ;;  %v949_v5 = vld [vmem:[%s1593_s1 + $0xd0] sm:$0xff]  ;;  %v106_v6 = vld [vmem:[%s1593_s1 + $0x28] sm:$0xff]  ;;  %v105_v8 = vld [vmem:[%s1593_s1 + $0x20] sm:$0xff]  ;;  %s1037_s28 = smov 64   ;;  %s1038_s29 = smov 72   ;;  %vm1610_vm7 = vcmask 130048  }
   0x4   :  { %151 = vmatpush.msra.mxu0 %v932_v4  ;;  %246 = vmatpush.msra.mxu2 %v949_v5  ;;  %v21_v7 = vld [vmem:[%s1592_s0 + $0x8] sm:$0xff]  ;;  %v104_v9 = vld [vmem:[%s1593_s1 + $0x18] sm:$0xff]  ;;  %v22_v11 = vld [vmem:[%s1592_s0 + $0x10] sm:$0xff]  ;;  %s1039_s30 = smov 80   ;;  %s1040_s6 = smov 88   ;;  %vm1609_vm8 = vcmask 195584  }
   0x5   :  { %189 = vmatpush.msra.mxu1 %v108_v2  ;;  %v23_v10 = vld [vmem:[%s1592_s0 + $0x18] sm:$0xff]  ;;  %v1023_v12 = vld [vmem:[%s1594_s2] ss:$0 sm:$0xff]  ;;  %s1033_s0 = smov 32   ;;  %s1041_s7 = smov 96   ;;  %v103_v13 = vld [vmem:[%s1593_s1 + $0x10] sm:$0xff] }
   0x6   :  { %s1042_s8 = smov 104   ;;  %s1043_s9 = smov 112   ;;  %v931_v14 = vld [vmem:[%s1593_s1 + $0x80] sm:$0xff]  ;;  %v948_v15 = vld [vmem:[%s1593_s1 + $0xc8] sm:$0xff]  ;;  %v930_v17 = vld [vmem:[%s1593_s1 + $0x78] sm:$0xff]  ;;  %vm1611_vm9 = vcmask 261120  }
   0x7   :  { %190 = vmatpush.msra.mxu1 %v107_v3  ;;  %s1044_s10 = smov 120   ;;  %152 = vmatpush.msra.mxu0 %v931_v14  ;;  %v102_v16 = vld [vmem:[%s1593_s1 + $0x8] sm:$0xff]  ;;  %v947_v18 = vld [vmem:[%s1593_s1 + $0xc0] sm:$0xff]  ;;  %v929_v20 = vld [vmem:[%s1593_s1 + $0x70] sm:$0xff]  ;;  %vm1608_vm10 = vcmask 326656   ;;  %vm1607_vm11 = vcmask 392192  }
   0x8   :  { %247 = vmatpush.msra.mxu2 %v948_v15  ;;  %v101_v19 = vld [vmem:[%s1593_s1] sm:$0xff]  ;;  %v946_v21 = vld [vmem:[%s1593_s1 + $0xb8] sm:$0xff]  ;;  %v928_v22 = vld [vmem:[%s1593_s1 + $0x68] sm:$0xff]  ;;  %vm1606_vm12 = vcmask 457728   ;;  %vm1605_vm13 = vcmask 523264   ;;  %vm1601_vm14 = vcmask 654336  }
   0x9   :  { %191 = vmatpush.msra.mxu1 %v106_v6  ;;  %153 = vmatpush.msra.mxu0 %v930_v17  ;;  %v945_v23 = vld [vmem:[%s1593_s1 + $0xb0] sm:$0xff]  ;;  %v927_v24 = vld [vmem:[%s1593_s1 + $0x60] sm:$0xff]  ;;  %v944_v25 = vld [vmem:[%s1593_s1 + $0xa8] sm:$0xff]  ;;  %vm1599_vm15 = vcmask 719872  }
   0xa   :  { %42 = vrot.lane.b32.xlu1 %v21_v7, %s1027_s20  ;;  %30 = vrot.lane.b32.xlu0 %v21_v7, %s1028_s21  ;;  %v926_v26 = vld [vmem:[%s1593_s1 + $0x58] sm:$0xff]  ;;  %v943_v27 = vld [vmem:[%s1593_s1 + $0xa0] sm:$0xff] }
   0xb   :  { %54 = vrot.lane.b32.xlu2 %v21_v7, %s1029_s24  ;;  %192 = vmatpush.msra.mxu1 %v105_v8  ;;  %v925_v28 = vld [vmem:[%s1593_s1 + $0x50] sm:$0xff]  ;;  %v942_v29 = vld [vmem:[%s1593_s1 + $0x98] sm:$0xff]  ;;  %v924_v30 = vld [vmem:[%s1593_s1 + $0x48] sm:$0xff] }
   0xc   :  { %248 = vmatpush.msra.mxu2 %v947_v18  ;;  %154 = vmatpush.msra.mxu0 %v929_v20  ;;  %v941_v31 = vld [vmem:[%s1593_s1 + $0x90] sm:$0xff] }
   0xd   :  { %193 = vmatpush.msra.mxu1 %v104_v9 }
   0xe   :  { %249 = vmatpush.msra.mxu2 %v946_v21  ;;  %155 = vmatpush.msra.mxu0 %v928_v22 }
   0xf   :  { %194 = vmatpush.msra.mxu1 %v103_v13 }
  0x10   :  { %250 = vmatpush.msra.mxu2 %v945_v23  ;;  %156 = vmatpush.msra.mxu0 %v927_v24  ;;  %v272_v24 = vld [vmem:[%s1594_s2] sm:$0x1] }
  0x11   :  { %195 = vmatpush.msra.mxu1 %v102_v16 }
  0x12   :  { %34 = vrot.lane.b32.xlu1 %v23_v10, %s1028_s21  ;;  %32 = vrot.lane.b32.xlu0 %v22_v11, %s1028_s21  ;;  %s1034_s21 = smov 40  }
  0x13   :  { %44 = vrot.lane.b32.xlu2 %v22_v11, %s1027_s20  ;;  %196 = vmatpush.msra.mxu1 %v101_v19 }
  0x14   :  { %251 = vmatpush.msra.mxu2 %v944_v25  ;;  %157 = vmatpush.msra.mxu0 %v926_v26 }
  0x16   :  { %252 = vmatpush.msra.mxu2 %v943_v27  ;;  %158 = vmatpush.msra.mxu0 %v925_v28 }
  0x18   :  { %253 = vmatpush.msra.mxu2 %v942_v29  ;;  %159 = vmatpush.msra.mxu0 %v924_v30 }
  0x1a   :  { %56 = vrot.lane.b32.xlu1 %v22_v11, %s1029_s24  ;;  %46 = vrot.lane.b32.xlu0 %v23_v10, %s1027_s20  ;;  %s1035_s20 = smov 48  }
  0x1b   :  { %58 = vrot.lane.b32.xlu2 %v23_v10, %s1029_s24  ;;  %s1036_s24 = smov 56   ;;  %254 = vmatpush.msra.mxu2 %v941_v31 }
  0x22   :  { %275 = vrot.lane.b32.xlu0 %v1023_v12, %s1030_s25  ;;  %278 = vrot.lane.b32.xlu1 %v1023_v12, %s1031_s26 }
  0x23   :  { %281 = vrot.lane.b32.xlu2 %v1023_v12, %s1032_s27 }
  0x2a   :  { %284 = vrot.lane.b32.xlu0 %v1023_v12, %s1033_s0  ;;  %287 = vrot.lane.b32.xlu1 %v1023_v12, %s1034_s21 }
  0x2b   :  { %290 = vrot.lane.b32.xlu2 %v1023_v12, %s1035_s20 }
  0x32   :  { %293 = vrot.lane.b32.xlu0 %v1023_v12, %s1036_s24  ;;  %296 = vrot.lane.b32.xlu1 %v1023_v12, %s1037_s28 }
  0x33   :  { %299 = vrot.lane.b32.xlu2 %v1023_v12, %s1038_s29 }
  0x3a   :  { %302 = vrot.lane.b32.xlu0 %v1023_v12, %s1039_s30  ;;  %305 = vrot.lane.b32.xlu1 %v1023_v12, %s1040_s6 }
  0x3b   :  { %308 = vrot.lane.b32.xlu2 %v1023_v12, %s1041_s7 }
  0x42   :  { %311 = vrot.lane.b32.xlu0 %v1023_v12, %s1042_s8  ;;  %314 = vrot.lane.b32.xlu1 %v1023_v12, %s1043_s9 }
  0x43   :  { %317 = vrot.lane.b32.xlu2 %v1023_v12, %s1044_s10 }
  0x5d   :  { %v53_v32 = vpop.permute.xlu2 %52 }
  0x65   :  { %v55_v39 = vpop.permute.xlu2 %54 }
  0x6d   :  { %v45_v48 = vpop.permute.xlu2 %44 }
  0x74   :  { %v41_v33 = vpop.permute.xlu1 %40  ;;  %v29_v34 = vpop.permute.xlu0 %28 }
  0x75   :  { %v65_v35 = vsel %vm64_vm0, %v29_v34, %v41_v33  ;;  %v59_v60 = vpop.permute.xlu2 %58 }
  0x76   :  { %v70_v36 = vsel %vm69_vm1, %v65_v35, %v53_v32 }
  0x77   :  { %v76_v37 = vrot.slane %v70_v36, 1  ;;  %v83_v38 = vrot.slane %v70_v36, 7 }
  0x79   :  { %v97_v40 = vsel %vm82_vm2, %v76_v37, %v83_v38 }
  0x7a   :  { %937 = vmatmul.msk.f32.vlgmr.msra.gmra.mxu1 %vm1603_vm3, %v97_v40  ;;  %v115_v49 = vrot.slane %v97_v40, 1  ;;  %v211_v50 = vrot.slane %v97_v40, 2 }
  0x7c   :  { %v43_v41 = vpop.permute.xlu1 %42  ;;  %v31_v42 = vpop.permute.xlu0 %30 }
  0x7d   :  { %v66_v43 = vsel %vm64_vm0, %v31_v42, %v43_v41  ;;  %v282_v25 = vpop.permute.xlu2 %281 }
  0x7e   :  { %v71_v44 = vsel %vm69_vm1, %v66_v43, %v55_v39 }
  0x7f   :  { %v84_v45 = vrot.slane %v71_v44, 7  ;;  %v93_v46 = vrot.slane %v71_v44, 5 }
  0x81   :  { %v85_v47 = vsel %vm82_vm2, %v83_v38, %v84_v45  ;;  %v99_v57 = vsel %vm82_vm2, %v84_v45, %v93_v46 }
  0x82   :  { %v116_v51 = vrot.slane %v85_v47, 1  ;;  %938 = vmatmul.msk.f32.gmra.mxu1 %vm1603_vm3, %v85_v47  ;;  %v212_v52 = vrot.slane %v85_v47, 2  ;;  %v118_v58 = vrot.slane %v99_v57, 1  ;;  %v214_v59 = vrot.slane %v99_v57, 2 }
  0x83   :  { %v354_v47 = vlaneseq }
  0x84   :  { %v35_v53 = vpop.permute.xlu1 %34  ;;  %v33_v54 = vpop.permute.xlu0 %32  ;;  %v117_v55 = vsel %vm114_vm4, %v115_v49, %v116_v51  ;;  %v213_v56 = vsel %vm210_vm5, %v211_v50, %v212_v52  ;;  %v119_v0 = vsel %vm114_vm4, %v116_v51, %v118_v58  ;;  %v215_v1 = vsel %vm210_vm5, %v212_v52, %v214_v59 }
  0x85   :  { %933 = vmatmul.msk.f32.vlgmr.msra.gmra.mxu0 %vm1603_vm3, %v117_v55  ;;  %950 = vmatmul.msk.f32.vlgmr.msra.gmra.mxu2 %vm1603_vm3, %v213_v56  ;;  %v67_v61 = vsel %vm64_vm0, %v33_v54, %v45_v48  ;;  %v291_v32 = vpop.permute.xlu2 %290  ;;  %v1247_v49 = vshrl.u32 %v354_v47, 7 }
  0x87   :  { %v370_v52 = vadd.s32 120, %v1247_v49  ;;  %v369_v54 = vadd.s32 112, %v1247_v49  ;;  %v368_v55 = vadd.s32 104, %v1247_v49 }
  0x89   :  { %v482_v59 = vand.u32 7, %v370_v52 }
  0x8c   :  { %v57_v62 = vpop.permute.xlu1 %56  ;;  %v47_v63 = vpop.permute.xlu0 %46 }
  0x8d   :  { %v72_v2 = vsel %vm69_vm1, %v67_v61, %v57_v62  ;;  %v68_v3 = vsel %vm64_vm0, %v35_v53, %v47_v63  ;;  %934 = vmatmul.msk.f32.gmra.mxu0 %vm1603_vm3, %v119_v0  ;;  %951 = vmatmul.msk.f32.gmra.mxu2 %vm1603_vm3, %v215_v1  ;;  %v300_v40 = vpop.permute.xlu2 %299  ;;  %v1253_v53 = vand.u32 127, %v354_v47  ;;  %vm1598_vm0 = vcmask 785408  }
  0x8e   :  { %v77_v4 = vrot.slane %v72_v2, 1  ;;  %v86_v5 = vrot.slane %v72_v2, 7  ;;  %v73_v6 = vsel %vm69_vm1, %v68_v3, %v59_v60  ;;  %v475_v60 = vand.u32 7, %v369_v54 }
  0x8f   :  { %v87_v7 = vrot.slane %v73_v6, 7  ;;  %v94_v10 = vrot.slane %v73_v6, 5  ;;  %v367_v61 = vadd.s32 96, %v1247_v49  ;;  %vm1260_vm1 = vcmp.eq.s32.totalorder %v482_v59, %v1253_v53 }
  0x90   :  { %v98_v8 = vsel %vm82_vm2, %v77_v4, %v86_v5  ;;  %v468_v0 = vand.u32 7, %v368_v55  ;;  %v366_v1 = vadd.s32 88, %v1247_v49  ;;  %v1045_v4 = vmov 1.0  }
  0x91   :  { %v88_v9 = vsel %vm82_vm2, %v86_v5, %v87_v7  ;;  %v120_v11 = vrot.slane %v98_v8, 1  ;;  %939 = vmatmul.msk.f32.gmra.mxu1 %vm1603_vm3, %v98_v8  ;;  %v216_v12 = vrot.slane %v98_v8, 2  ;;  %v100_v17 = vsel %vm82_vm2, %v87_v7, %v94_v10  ;;  %988 = vmatpush.msk.msrb.mxu0 %vm1260_vm1, %v1045_v4 }
  0x92   :  { %v121_v13 = vrot.slane %v88_v9, 1  ;;  %v217_v14 = vrot.slane %v88_v9, 2  ;;  %v123_v18 = vrot.slane %v100_v17, 1  ;;  %v219_v19 = vrot.slane %v100_v17, 2 }
  0x93   :  { %vm1600_vm2 = vcmask 850944   ;;  %v461_v6 = vand.u32 7, %v367_v61  ;;  %v365_v7 = vadd.s32 80, %v1247_v49  ;;  %v357_v54 = vadd.s32 16, %v1247_v49 }
  0x94   :  { %v122_v15 = vsel %vm114_vm4, %v120_v11, %v121_v13  ;;  %v218_v16 = vsel %vm210_vm5, %v216_v12, %v217_v14  ;;  %v124_v20 = vsel %vm114_vm4, %v121_v13, %v123_v18  ;;  %v220_v21 = vsel %vm210_vm5, %v217_v14, %v219_v19  ;;  %v276_v22 = vpop.permute.xlu0 %275  ;;  %v279_v23 = vpop.permute.xlu1 %278 }
  0x95   :  { %935 = vmatmul.msk.f32.gmra.mxu0 %vm1603_vm3, %v122_v15  ;;  %952 = vmatmul.msk.f32.gmra.mxu2 %vm1603_vm3, %v218_v16  ;;  %v321_v26 = vsel %vm320_vm6, %v272_v24, %v276_v22  ;;  %v309_v56 = vpop.permute.xlu2 %308  ;;  %vm1270_vm4 = vcmp.eq.s32.totalorder %v475_v60, %v1253_v53  ;;  %vm1602_vm5 = vcmask 916480   ;;  %v454_v12 = vand.u32 7, %v366_v1 }
  0x96   :  { %v323_v27 = vsel %vm1610_vm7, %v321_v26, %v279_v23  ;;  %989 = vmatpush.msk.msrb.mxu0 %vm1270_vm4, %v1045_v4  ;;  %v364_v13 = vadd.s32 72, %v1247_v49  ;;  %v447_v15 = vand.u32 7, %v365_v7  ;;  %v363_v16 = vadd.s32 64, %v1247_v49 }
  0x97   :  { %v325_v29 = vsel %vm1609_vm8, %v323_v27, %v282_v25  ;;  %v362_v22 = vadd.s32 56, %v1247_v49  ;;  %v361_v27 = vadd.s32 48, %v1247_v49  ;;  %v391_v60 = vand.u32 7, %v357_v54  ;;  %v768_v54 = vld [vmem:[%s1596_s3] sm:$0x1] }
  0x98   :  { %v433_v26 = vand.u32 7, %v363_v16  ;;  %v377_v63 = vand.u32 7, %v1247_v49 }
  0x99   :  { %940 = vmatmul.msk.f32.gmra.mxu1 %vm1603_vm3, %v88_v9  ;;  %vm1402_vm7 = vcmp.eq.s32.totalorder %v391_v60, %v1253_v53 }
  0x9c   :  { %v285_v28 = vpop.permute.xlu0 %284  ;;  %v288_v30 = vpop.permute.xlu1 %287 }
  0x9d   :  { %936 = vmatmul.msk.f32.gmra.mxu0 %vm1603_vm3, %v124_v20  ;;  %953 = vmatmul.msk.f32.gmra.mxu2 %vm1603_vm3, %v220_v21  ;;  %v327_v31 = vsel %vm1611_vm9, %v325_v29, %v285_v28  ;;  %v318_v18 = vpop.permute.xlu2 %317  ;;  %v440_v21 = vand.u32 7, %v364_v13 }
  0x9e   :  { %v329_v33 = vsel %vm1608_vm10, %v327_v31, %v288_v30 }
  0x9f   :  { %v331_v37 = vsel %vm1607_vm11, %v329_v33, %v291_v32  ;;  %v426_v32 = vand.u32 7, %v362_v22  ;;  %v360_v33 = vadd.s32 40, %v1247_v49 }
  0xa4   :  { %v294_v34 = vpop.permute.xlu0 %293  ;;  %v297_v38 = vpop.permute.xlu1 %296 }
  0xa5   :  { %v333_v39 = vsel %vm1606_vm12, %v331_v37, %v294_v34 }
  0xa6   :  { %v335_v42 = vsel %vm1605_vm13, %v333_v39, %v297_v38  ;;  %vm1343_vm13 = vcmp.eq.s32.totalorder %v426_v32, %v1253_v53 }
  0xa7   :  { %v336_v45 = vsel %vm1603_vm3, %v335_v42, %v300_v40  ;;  %vm1318_vm3 = vcmp.eq.s32.totalorder %v440_v21, %v1253_v53  ;;  %v419_v42 = vand.u32 7, %v361_v27 }
  0xa9   :  { %vm1356_vm12 = vcmp.eq.s32.totalorder %v419_v42, %v1253_v53 }
  0xac   :  { %v303_v44 = vpop.permute.xlu0 %302  ;;  %v306_v48 = vpop.permute.xlu1 %305 }
  0xad   :  { %v338_v50 = vsel %vm1601_vm14, %v336_v45, %v303_v44  ;;  %vm1299_vm14 = vcmp.eq.s32.totalorder %v454_v12, %v1253_v53  ;;  %v359_v44 = vadd.s32 32, %v1247_v49 }
  0xae   :  { %v340_v57 = vsel %vm1599_vm15, %v338_v50, %v306_v48  ;;  %vm1289_vm15 = vcmp.eq.s32.totalorder %v461_v6, %v1253_v53  ;;  %v412_v48 = vand.u32 7, %v360_v33  ;;  %v358_v50 = vadd.s32 24, %v1247_v49 }
  0xaf   :  { %v342_v2 = vsel %vm1598_vm0, %v340_v57, %v309_v56  ;;  %vm1280_vm0 = vcmp.eq.s32.totalorder %v468_v0, %v1253_v53  ;;  %v356_v57 = vadd.s32 8, %v1247_v49 }
  0xb0   :  { %990 = vmatpush.msk.msrb.mxu0 %vm1280_vm0, %v1045_v4  ;;  %vm1368_vm11 = vcmp.eq.s32.totalorder %v412_v48, %v1253_v53  ;;  %v398_v56 = vand.u32 7, %v358_v50 }
  0xb2   :  { %991 = vmatpush.msk.msrb.mxu0 %vm1289_vm15, %v1045_v4  ;;  %vm1391_vm8 = vcmp.eq.s32.totalorder %v398_v56, %v1253_v53 }
  0xb4   :  { %v312_v3 = vpop.permute.xlu0 %311  ;;  %v315_v9 = vpop.permute.xlu1 %314  ;;  %992 = vmatpush.msk.msrb.mxu0 %vm1299_vm14, %v1045_v4 }
  0xb5   :  { %v344_v8 = vsel %vm1600_vm2, %v342_v2, %v312_v3  ;;  %vm1604_vm2 = vcmask 982016  }
  0xb6   :  { %v346_v17 = vsel %vm1602_vm5, %v344_v8, %v315_v9  ;;  %vm1309_vm5 = vcmp.eq.s32.totalorder %v447_v15, %v1253_v53 }
  0xb7   :  { %v348_v23 = vsel %vm1604_vm2, %v346_v17, %v318_v18  ;;  %993 = vmatpush.msk.msrb.mxu0 %vm1309_vm5, %v1045_v4  ;;  %vm1329_vm2 = vcmp.eq.s32.totalorder %v433_v26, %v1253_v53 }
  0xb8   :  { %v349_v34 = vperm.slane %v348_v23, 0 }
  0xb9   :  { %994 = vmatpush.msk.msrb.mxu0 %vm1318_vm3, %v1045_v4 }
  0xbb   :  { %995 = vmatpush.msk.msrb.mxu0 %vm1329_vm2, %v1045_v4 }
  0xbd   :  { %996 = vmatpush.msk.msrb.mxu0 %vm1343_vm13, %v1045_v4 }
  0xbf   :  { %997 = vmatpush.msk.msrb.mxu0 %vm1356_vm12, %v1045_v4 }
  0xc1   :  { %998 = vmatpush.msk.msrb.mxu0 %vm1368_vm11, %v1045_v4 }
  0xf7   :  { %v1233_v35 = vpop.f32.mrf.mxu1 }
  0xff   :  { %v1245_v46 = vpop.f32.mrf.mxu1 }
 0x102   :  { %v1235_v36 = vpop.f32.mrf.mxu0 }
 0x103   :  { %v199_v45 = vadd.f32 %v1233_v35, %v1235_v36 }
 0x108   :  { %v1239_v41 = vpop.f32.mrf.mxu2 }
 0x109   :  { %v268_v52 = vadd.f32 %v1239_v41, %v199_v45 }
 0x10a   :  { %v1242_v43 = vpop.f32.mrf.mxu0 }
 0x10b   :  { %v202_v37 = vadd.f32 %v1245_v46, %v1242_v43 }
 0x10e   :  { %v204_v62 = vpop.f32.mrf.mxu1 }
 0x110   :  { %v1250_v51 = vpop.f32.mrf.mxu2 }
 0x111   :  { %v269_v47 = vadd.f32 %v1250_v51, %v202_v37  ;;  %v405_v51 = vand.u32 7, %v359_v44 }
 0x112   :  { %v167_v58 = vpop.f32.mrf.mxu0 }
 0x113   :  { %v205_v28 = vadd.f32 %v204_v62, %v167_v58  ;;  %v1362_v55 = vadd.f32 %v349_v34, %v269_v47  ;;  %v1374_v58 = vadd.f32 %v349_v34, %v268_v52  ;;  %vm1380_vm10 = vcmp.eq.s32.totalorder %v405_v51, %v1253_v53  ;;  %v1024_v47 = vld [vmem:[%s1595_s4] ss:$0 sm:$0xff] }
 0x114   :  { %999 = vmatpush.msk.msrb.mxu0 %vm1380_vm10, %v1045_v4  ;;  %v384_v62 = vand.u32 7, %v356_v57 }
 0x116   :  { %v207_v24 = vpop.f32.mrf.mxu1  ;;  %1000 = vmatpush.msk.msrb.mxu0 %vm1391_vm8, %v1045_v4 }
 0x118   :  { %v262_v10 = vpop.f32.mrf.mxu2  ;;  %1001 = vmatpush.msk.msrb.mxu0 %vm1402_vm7, %v1045_v4 }
 0x119   :  { %v270_v38 = vadd.f32 %v262_v10, %v205_v28 }
 0x11a   :  { %v170_v19 = vpop.f32.mrf.mxu0 }
 0x11b   :  { %v208_v29 = vadd.f32 %v207_v24, %v170_v19  ;;  %v1350_v35 = vadd.f32 %v349_v34, %v270_v38 }
 0x120   :  { %v265_v30 = vpop.f32.mrf.mxu2 }
 0x121   :  { %v271_v39 = vadd.f32 %v265_v30, %v208_v29 }
 0x123   :  { %v1337_v43 = vadd.f32 %v349_v34, %v271_v39 }
 0x125   :  { %628 = vmatpush.msra.mxu3 %v1337_v43 }
 0x127   :  { %629 = vmatpush.msra.mxu3 %v1350_v35 }
 0x129   :  { %630 = vmatpush.msra.mxu3 %v1362_v55 }
 0x12b   :  { %631 = vmatpush.msra.mxu3 %v1374_v58 }
 0x12c   :  { %970 = vmatmul.msk.f32.vlgmr.msra.gmra.mxu3 %vm1611_vm9, %v1045_v4  ;;  %vm566_vm9 = vcmp.eq.s32.totalorder %v384_v62, %v1253_v53 }
 0x12d   :  { %971 = vmatpush.msk.msrb.mxu3 %vm1260_vm1, %v1045_v4  ;;  %1002 = vmatpush.msk.msrb.mxu0 %vm566_vm9, %v1045_v4  ;;  %vm1650_vm1 = vcmask 785408  }
 0x12f   :  { %972 = vmatpush.msk.msrb.mxu3 %vm1270_vm4, %v1045_v4  ;;  %vm1652_vm4 = vcmask 916480  }
 0x131   :  { %973 = vmatpush.msk.msrb.mxu3 %vm1280_vm0, %v1045_v4  ;;  %vm1649_vm0 = vcmask 719872  }
 0x133   :  { %974 = vmatpush.msk.msrb.mxu3 %vm1289_vm15, %v1045_v4  ;;  %vm1648_vm15 = vcmask 654336  }
 0x135   :  { %975 = vmatpush.msk.msrb.mxu3 %vm1299_vm14, %v1045_v4  ;;  %vm1647_vm14 = vcmask 588800  }
 0x137   :  { %976 = vmatpush.msk.msrb.mxu3 %vm1309_vm5, %v1045_v4  ;;  %vm1653_vm5 = vcmask 982016  }
 0x139   :  { %977 = vmatpush.msk.msrb.mxu3 %vm1318_vm3, %v1045_v4  ;;  %vm565_vm3 = vcmp.eq.s32.totalorder %v377_v63, %v1253_v53 }
 0x13a   :  { %1003 = vmatpush.msk.msrb.mxu0 %vm565_vm3, %v1045_v4 }
 0x13b   :  { %978 = vmatpush.msk.msrb.mxu3 %vm1329_vm2, %v1045_v4  ;;  %vm1651_vm2 = vcmask 850944  }
 0x13d   :  { %979 = vmatpush.msk.msrb.mxu3 %vm1343_vm13, %v1045_v4  ;;  %vm1646_vm13 = vcmask 523264  }
 0x13f   :  { %980 = vmatpush.msk.msrb.mxu3 %vm1356_vm12, %v1045_v4  ;;  %vm1645_vm12 = vcmask 457728  }
 0x141   :  { %981 = vmatpush.msk.msrb.mxu3 %vm1368_vm11, %v1045_v4  ;;  %vm1644_vm11 = vcmask 392192  }
 0x143   :  { %982 = vmatpush.msk.msrb.mxu3 %vm1380_vm10, %v1045_v4  ;;  %vm1643_vm10 = vcmask 326656  }
 0x145   :  { %983 = vmatpush.msk.msrb.mxu3 %vm1391_vm8, %v1045_v4  ;;  %vm1641_vm8 = vcmask 195584  }
 0x147   :  { %984 = vmatpush.msk.msrb.mxu3 %vm1402_vm7, %v1045_v4  ;;  %vm1640_vm7 = vcmask 130048  }
 0x149   :  { %985 = vmatpush.msk.msrb.mxu3 %vm566_vm9, %v1045_v4  ;;  %vm1642_vm9 = vcmask 261120  }
 0x14b   :  { %986 = vmatpush.msk.msrb.mxu3 %vm565_vm3, %v1045_v4  ;;  %vm1654_vm3 = vmmov %vm1642_vm9 }
 0x1af   :  { %v633_v1 = vpop.f32.mrf.mxu3 }
 0x1b0   :  { %652 = vmatmul.f32.vlgmr.msrb.gmra.mxu3 %v633_v1 }
 0x233   :  { %v653_v2 = vpop.f32.mrf.mxu3 }
 0x234   :  { %v656_v3 = vmul.f32 0.001953125, %v653_v2 }
 0x236   :  { %664 = vrot.lane.b32.xlu2 %v656_v3, %s1032_s27  ;;  %661 = vrot.lane.b32.xlu1 %v656_v3, %s1031_s26 }
 0x237   :  { %658 = vrot.lane.b32.xlu0 %v656_v3, %s1030_s25 }
 0x23e   :  { %673 = vrot.lane.b32.xlu2 %v656_v3, %s1035_s20  ;;  %670 = vrot.lane.b32.xlu1 %v656_v3, %s1034_s21 }
 0x23f   :  { %667 = vrot.lane.b32.xlu0 %v656_v3, %s1033_s0 }
 0x246   :  { %682 = vrot.lane.b32.xlu2 %v656_v3, %s1038_s29  ;;  %679 = vrot.lane.b32.xlu1 %v656_v3, %s1037_s28 }
 0x247   :  { %676 = vrot.lane.b32.xlu0 %v656_v3, %s1036_s24 }
 0x24e   :  { %691 = vrot.lane.b32.xlu2 %v656_v3, %s1041_s7  ;;  %688 = vrot.lane.b32.xlu1 %v656_v3, %s1040_s6 }
 0x24f   :  { %685 = vrot.lane.b32.xlu0 %v656_v3, %s1039_s30 }
 0x256   :  { %700 = vrot.lane.b32.xlu2 %v656_v3, %s1044_s10  ;;  %697 = vrot.lane.b32.xlu1 %v656_v3, %s1043_s9 }
 0x257   :  { %694 = vrot.lane.b32.xlu0 %v656_v3, %s1042_s8 }
 0x25e   :  { %852 = vrot.lane.b32.xlu1 %v1024_v47, %s1032_s27  ;;  %846 = vrot.lane.b32.xlu2 %v1024_v47, %s1030_s25 }
 0x25f   :  { %849 = vrot.lane.b32.xlu0 %v1024_v47, %s1031_s26 }
 0x266   :  { %861 = vrot.lane.b32.xlu1 %v1024_v47, %s1035_s20  ;;  %855 = vrot.lane.b32.xlu2 %v1024_v47, %s1033_s0 }
 0x267   :  { %858 = vrot.lane.b32.xlu0 %v1024_v47, %s1034_s21 }
 0x26e   :  { %870 = vrot.lane.b32.xlu1 %v1024_v47, %s1038_s29  ;;  %864 = vrot.lane.b32.xlu2 %v1024_v47, %s1036_s24 }
 0x26f   :  { %867 = vrot.lane.b32.xlu0 %v1024_v47, %s1037_s28 }
 0x276   :  { %879 = vrot.lane.b32.xlu1 %v1024_v47, %s1041_s7  ;;  %876 = vrot.lane.b32.xlu2 %v1024_v47, %s1040_s6 }
 0x277   :  { %873 = vrot.lane.b32.xlu0 %v1024_v47, %s1039_s30 }
 0x290   :  { %v665_v49 = vpop.permute.xlu2 %664 }
 0x298   :  { %v674_v6 = vpop.permute.xlu2 %673 }
 0x2a0   :  { %v683_v13 = vpop.permute.xlu2 %682 }
 0x2a8   :  { %v662_v53 = vpop.permute.xlu1 %661  ;;  %v692_v21 = vpop.permute.xlu2 %691 }
 0x2a9   :  { %v659_v5 = vpop.permute.xlu0 %658 }
 0x2aa   :  { %v703_v7 = vsel %vm320_vm6, %v656_v3, %v659_v5 }
 0x2ab   :  { %v704_v9 = vsel %vm1640_vm7, %v703_v7, %v662_v53 }
 0x2ac   :  { %v705_v11 = vsel %vm1641_vm8, %v704_v9, %v665_v49  ;;  %v843_v9 = vld [vmem:[%s1595_s4] sm:$0x1] }
 0x2b0   :  { %v671_v8 = vpop.permute.xlu1 %670  ;;  %v701_v30 = vpop.permute.xlu2 %700 }
 0x2b1   :  { %v668_v10 = vpop.permute.xlu0 %667 }
 0x2b2   :  { %v706_v12 = vsel %vm1642_vm9, %v705_v11, %v668_v10 }
 0x2b3   :  { %v707_v14 = vsel %vm1643_vm10, %v706_v12, %v671_v8  ;;  %vm1655_vm10 = vcmask 130048  }
 0x2b4   :  { %v708_v17 = vsel %vm1644_vm11, %v707_v14, %v674_v6  ;;  %vm1656_vm11 = vmmov %vm1655_vm10 }
 0x2b8   :  { %v680_v15 = vpop.permute.xlu1 %679 }
 0x2b9   :  { %v677_v16 = vpop.permute.xlu0 %676 }
 0x2ba   :  { %v709_v18 = vsel %vm1645_vm12, %v708_v17, %v677_v16  ;;  %vm1657_vm12 = vcmask 195584  }
 0x2bb   :  { %v710_v19 = vsel %vm1646_vm13, %v709_v18, %v680_v15  ;;  %vm1658_vm13 = vmmov %vm1654_vm3 }
 0x2bc   :  { %v711_v23 = vsel %vm1647_vm14, %v710_v19, %v683_v13  ;;  %vm1659_vm14 = vmmov %vm1657_vm12 }
 0x2c0   :  { %v689_v20 = vpop.permute.xlu1 %688 }
 0x2c1   :  { %v686_v22 = vpop.permute.xlu0 %685 }
 0x2c2   :  { %v712_v24 = vsel %vm1648_vm15, %v711_v23, %v686_v22  ;;  %vm1660_vm15 = vcmask 326656  }
 0x2c3   :  { %v713_v25 = vsel %vm1649_vm0, %v712_v24, %v689_v20  ;;  %vm1661_vm0 = vmmov %vm1654_vm3 }
 0x2c4   :  { %v714_v27 = vsel %vm1650_vm1, %v713_v25, %v692_v21  ;;  %vm1663_vm1 = vcmask 457728  }
 0x2c8   :  { %v698_v26 = vpop.permute.xlu1 %697 }
 0x2c9   :  { %v695_v28 = vpop.permute.xlu0 %694 }
 0x2ca   :  { %v715_v29 = vsel %vm1651_vm2, %v714_v27, %v695_v28  ;;  %vm1664_vm2 = vmmov %vm1660_vm15 }
 0x2cb   :  { %v716_v31 = vsel %vm1652_vm4, %v715_v29, %v698_v26  ;;  %vm1665_vm4 = vcmask 523264  }
 0x2cc   :  { %v717_v32 = vsel %vm1653_vm5, %v716_v31, %v701_v30 }
 0x2cd   :  { %v718_v33 = vperm.slane %v717_v32, 0 }
 0x2cf   :  { %v1486_v34 = vsub.f32 %v1337_v43, %v718_v33  ;;  %v1489_v37 = vsub.f32 %v1350_v35, %v718_v33  ;;  %v1494_v39 = vsub.f32 %v1362_v55, %v718_v33  ;;  %v1499_v42 = vsub.f32 %v1374_v58, %v718_v33  ;;  %v847_v58 = vpop.permute.xlu2 %846 }
 0x2d0   :  { %v853_v59 = vpop.permute.xlu1 %852  ;;  %v891_v11 = vsel %vm320_vm6, %v843_v9, %v847_v58 }
 0x2d1   :  { %v726_v38 = vmul.f32 %v1486_v34, %v1486_v34  ;;  %v725_v40 = vmul.f32 %v1489_v37, %v1489_v37  ;;  %v724_v44 = vmul.f32 %v1494_v39, %v1494_v39  ;;  %v723_v45 = vmul.f32 %v1499_v42, %v1499_v42  ;;  %v850_v61 = vpop.permute.xlu0 %849 }
 0x2d2   :  { %v892_v15 = vsel %vm1656_vm11, %v891_v11, %v850_v61 }
 0x2d3   :  { %739 = vmatpush.msra.mxu3 %v726_v38  ;;  %v893_v19 = vsel %vm1659_vm14, %v892_v15, %v853_v59 }
 0x2d5   :  { %740 = vmatpush.msra.mxu3 %v725_v40 }
 0x2d7   :  { %741 = vmatpush.msra.mxu3 %v724_v44  ;;  %v856_v60 = vpop.permute.xlu2 %855 }
 0x2d8   :  { %v862_v62 = vpop.permute.xlu1 %861  ;;  %v894_v22 = vsel %vm1661_vm0, %v893_v19, %v856_v60 }
 0x2d9   :  { %742 = vmatpush.msra.mxu3 %v723_v45  ;;  %v859_v63 = vpop.permute.xlu0 %858 }
 0x2da   :  { %987 = vmatmul.msk.f32.vlgmr.msra.gmra.mxu3 %vm1654_vm3, %v1045_v4  ;;  %v895_v26 = vsel %vm1664_vm2, %v894_v22, %v859_v63  ;;  %vm1667_vm3 = vcmask 588800  }
 0x2db   :  { %vm1672_vm11 = vmmov %vm1667_vm3 }
 0x2df   :  { %v865_v0 = vpop.permute.xlu2 %864 }
 0x2e0   :  { %v871_v1 = vpop.permute.xlu1 %870 }
 0x2e1   :  { %v868_v3 = vpop.permute.xlu0 %867 }
 0x2e7   :  { %v877_v2 = vpop.permute.xlu2 %876 }
 0x2e8   :  { %v880_v49 = vpop.permute.xlu1 %879 }
 0x2e9   :  { %v874_v5 = vpop.permute.xlu0 %873 }
 0x35d   :  { %v744_v4 = vpop.f32.mrf.mxu3 }
 0x35e   :  { %763 = vmatmul.f32.vlgmr.msrb.gmra.mxu0 %v744_v4 }
 0x3db   :  { %v764_v43 = vpop.f32.mrf.mxu0 }
 0x3dc   :  { %v767_v46 = vmul.f32 0.001953125, %v764_v43 }
 0x3de   :  { %v769_v48 = vadd.f32 1e-05, %v767_v46 }
 0x3e0   :  { %1025 = vrsqrt.f32 %v769_v48  ;;  %vm776_vm8 = vweird.f32 %v769_v48 }
 0x3e6   :  { %v1026_v50 = vpop.eup %1025 }
 0x3e7   :  { %v771_v52 = vmul.f32 %v1026_v50, %v769_v48  ;;  %vm777_vm7 = vweird.f32 %v1026_v50 }
 0x3e8   :  { %vm778_vm9 = vmor %vm776_vm8, %vm777_vm7  ;;  %vm1669_vm8 = vcmask 654336  }
 0x3e9   :  { %v772_v35 = vmul.f32 %v1026_v50, %v771_v52  ;;  %vm1668_vm7 = vmmov %vm1663_vm1 }
 0x3ea   :  { %vm1675_vm14 = vmmov %vm1669_vm8 }
 0x3eb   :  { %v773_v36 = vmul.f32 0.5, %v772_v35 }
 0x3ed   :  { %v774_v51 = vsub.f32 1.5, %v773_v36 }
 0x3ef   :  { %v775_v55 = vmul.f32 %v1026_v50, %v774_v51 }
 0x3f1   :  { %v779_v41 = vsel %vm778_vm9, %v1026_v50, %v775_v55  ;;  %vm1670_vm9 = vmmov %vm1665_vm4 }
 0x3f2   :  { %v780_v56 = vmul.f32 %v779_v41, %v768_v54 }
 0x3f4   :  { %v782_v57 = vperm.slane %v780_v56, 0 }
 0x3f6   :  { %789 = vrot.lane.b32.xlu2 %v782_v57, %s1032_s27  ;;  %786 = vrot.lane.b32.xlu1 %v782_v57, %s1031_s26 }
 0x3f7   :  { %783 = vrot.lane.b32.xlu0 %v782_v57, %s1030_s25 }
 0x3fe   :  { %798 = vrot.lane.b32.xlu2 %v782_v57, %s1035_s20  ;;  %795 = vrot.lane.b32.xlu1 %v782_v57, %s1034_s21 }
 0x3ff   :  { %792 = vrot.lane.b32.xlu0 %v782_v57, %s1033_s0 }
 0x406   :  { %807 = vrot.lane.b32.xlu2 %v782_v57, %s1038_s29  ;;  %804 = vrot.lane.b32.xlu1 %v782_v57, %s1037_s28 }
 0x407   :  { %801 = vrot.lane.b32.xlu0 %v782_v57, %s1036_s24 }
 0x40e   :  { %816 = vrot.lane.b32.xlu2 %v782_v57, %s1041_s7  ;;  %813 = vrot.lane.b32.xlu1 %v782_v57, %s1040_s6 }
 0x40f   :  { %810 = vrot.lane.b32.xlu0 %v782_v57, %s1039_s30 }
 0x416   :  { %825 = vrot.lane.b32.xlu2 %v782_v57, %s1044_s10  ;;  %819 = vrot.lane.b32.xlu1 %v782_v57, %s1042_s8 }
 0x417   :  { %822 = vrot.lane.b32.xlu0 %v782_v57, %s1043_s9 }
 0x41e   :  { %885 = vrot.lane.b32.xlu1 %v1024_v47, %s1043_s9  ;;  %888 = vrot.lane.b32.xlu2 %v1024_v47, %s1044_s10 }
 0x41f   :  { %882 = vrot.lane.b32.xlu0 %v1024_v47, %s1042_s8 }
 0x450   :  { %v790_v53 = vpop.permute.xlu2 %789 }
 0x458   :  { %v799_v8 = vpop.permute.xlu2 %798 }
 0x460   :  { %v808_v18 = vpop.permute.xlu2 %807 }
 0x468   :  { %v787_v6 = vpop.permute.xlu1 %786  ;;  %v817_v29 = vpop.permute.xlu2 %816 }
 0x469   :  { %v784_v7 = vpop.permute.xlu0 %783 }
 0x46a   :  { %v828_v10 = vsel %vm320_vm6, %v780_v56, %v784_v7  ;;  %vm1662_vm6 = vcmask 392192  }
 0x46b   :  { %v829_v12 = vsel %vm1655_vm10, %v828_v10, %v787_v6  ;;  %vm1666_vm5 = vmmov %vm1662_vm6  ;;  %vm1671_vm10 = vcmask 719872  }
 0x46c   :  { %v830_v16 = vsel %vm1657_vm12, %v829_v12, %v790_v53  ;;  %v896_v28 = vsel %vm1666_vm5, %v895_v26, %v862_v62  ;;  %vm1673_vm12 = vcmask 785408   ;;  %vm1677_vm0 = vmmov %vm1671_vm10 }
 0x46d   :  { %v897_v33 = vsel %vm1668_vm7, %v896_v28, %v865_v0 }
 0x46e   :  { %v898_v40 = vsel %vm1670_vm9, %v897_v33, %v868_v3 }
 0x46f   :  { %v899_v45 = vsel %vm1672_vm11, %v898_v40, %v871_v1 }
 0x470   :  { %v796_v13 = vpop.permute.xlu1 %795  ;;  %v826_v43 = vpop.permute.xlu2 %825  ;;  %v900_v50 = vsel %vm1675_vm14, %v899_v45, %v874_v5 }
 0x471   :  { %v793_v14 = vpop.permute.xlu0 %792  ;;  %v901_v35 = vsel %vm1677_vm0, %v900_v50, %v877_v2 }
 0x472   :  { %v831_v17 = vsel %vm1658_vm13, %v830_v16, %v793_v14  ;;  %vm1674_vm13 = vcmask 850944  }
 0x473   :  { %v832_v20 = vsel %vm1660_vm15, %v831_v17, %v796_v13  ;;  %vm1676_vm15 = vcmask 916480   ;;  %vm1680_vm2 = vmmov %vm1674_vm13 }
 0x474   :  { %v833_v24 = vsel %vm1662_vm6, %v832_v20, %v799_v8  ;;  %vm1678_vm6 = vcmask 982016  }
 0x475   :  { %vm1682_vm5 = vmmov %vm1678_vm6 }
 0x478   :  { %v805_v21 = vpop.permute.xlu1 %804  ;;  %v889_v56 = vpop.permute.xlu2 %888 }
 0x479   :  { %v802_v23 = vpop.permute.xlu0 %801 }
 0x47a   :  { %v834_v25 = vsel %vm1663_vm1, %v833_v24, %v802_v23  ;;  %vm1679_vm1 = vmmov %vm1673_vm12 }
 0x47b   :  { %v835_v27 = vsel %vm1665_vm4, %v834_v25, %v805_v21  ;;  %v902_v54 = vsel %vm1679_vm1, %v901_v35, %v880_v49  ;;  %vm1681_vm4 = vmmov %vm1676_vm15 }
 0x47c   :  { %v836_v31 = vsel %vm1667_vm3, %v835_v27, %v808_v18 }
 0x480   :  { %v814_v30 = vpop.permute.xlu1 %813 }
 0x481   :  { %v811_v32 = vpop.permute.xlu0 %810 }
 0x482   :  { %v837_v38 = vsel %vm1669_vm8, %v836_v31, %v811_v32 }
 0x483   :  { %v838_v44 = vsel %vm1671_vm10, %v837_v38, %v814_v30 }
 0x484   :  { %v839_v4 = vsel %vm1673_vm12, %v838_v44, %v817_v29 }
 0x488   :  { %v820_v47 = vpop.permute.xlu1 %819 }
 0x489   :  { %v840_v46 = vsel %vm1674_vm13, %v839_v4, %v820_v47  ;;  %v823_v48 = vpop.permute.xlu0 %822 }
 0x48a   :  { %v841_v52 = vsel %vm1676_vm15, %v840_v46, %v823_v48 }
 0x48b   :  { %v842_v36 = vsel %vm1678_vm6, %v841_v52, %v826_v43 }
 0x48c   :  { %v906_v55 = vperm.slane %v842_v36, 0 }
 0x48e   :  { %v907_v60 = vmul.f32 %v906_v55, %v1499_v42  ;;  %v908_v61 = vmul.f32 %v906_v55, %v1494_v39  ;;  %v909_v62 = vmul.f32 %v906_v55, %v1489_v37  ;;  %v910_v63 = vmul.f32 %v906_v55, %v1486_v34 }
 0x490   :  { %v886_v51 = vpop.permute.xlu1 %885 }
 0x491   :  { %v883_v41 = vpop.permute.xlu0 %882 }
 0x492   :  { %v903_v57 = vsel %vm1680_vm2, %v902_v54, %v883_v41 }
 0x493   :  { %v904_v58 = vsel %vm1681_vm4, %v903_v57, %v886_v51 }
 0x494   :  { %v905_v59 = vsel %vm1682_vm5, %v904_v58, %v889_v56 }
 0x495   :  { %v911_v0 = vperm.slane %v905_v59, 0 }
 0x497   :  { %v912_v1 = vadd.f32 %v911_v0, %v907_v60  ;;  %v913_v2 = vadd.f32 %v911_v0, %v908_v61  ;;  %v914_v3 = vadd.f32 %v911_v0, %v909_v62  ;;  %v915_v49 = vadd.f32 %v911_v0, %v910_v63 }
 0x499   :  { %916 = vst [vmem:[%s1597_s5] sm:$0xff] %v912_v1 }
 0x49a   :  { %917 = vst [vmem:[%s1597_s5 + $0x8] sm:$0xff] %v913_v2 }
 0x49b   :  { %918 = vst [vmem:[%s1597_s5 + $0x10] sm:$0xff] %v914_v3 }
 0x49c   :  { %919 = vst [vmem:[%s1597_s5 + $0x18] sm:$0xff] %v915_v49 }

</bundles_post_ra>
